<compile_context>
chip_gen: v5e
topology: v5e:2x2
jax: 0.10.0
libtpu: 0.0.40
codegen_flags: <defaults>
</compile_context>

<pallas_src>
import jax
import jax.numpy as jnp
from jax.experimental import pallas as pl
from jax.experimental.pallas import tpu as pltpu


def _perm_kernel(x_ref, o_ref):
    # x_ref: (TS, TH) tile, o_ref: (TH, TS) tile (batch dim squeezed out).
    # The 2-D last-two-dims transpose IS the whole compute of this module.
    o_ref[...] = x_ref[...].T


def _pick_tile(dim, preferred, align):
    """Choose a tile size for `dim`.

    Returns `preferred` (a multiple of `align`) when the dim is large enough,
    otherwise the largest multiple of `align` that fits, otherwise the full
    dim (a block equal to the full array dim is always a legal block shape).
    """
    if dim >= preferred:
        return preferred
    if dim >= align:
        return (dim // align) * align
    return dim


def perm_forward(x, *, ts=512, th=512):
    """Pallas TPU equivalent of torch `x.permute(0, 2, 1)`: (B, S, H) -> (B, H, S)."""
    B, S, H = x.shape
    itemsize = x.dtype.itemsize

    # TS becomes the OUTPUT's lane (last) dim, TH the INPUT's lane dim; keep
    # both 128-aligned whenever the array is big enough so the hot loop uses
    # unmasked full-width vxpose + unmasked vst. 128 alignment also covers the
    # sublane packing requirement of every dtype (f32:8, bf16:16, int8/fp8:32).
    TS = _pick_tile(S, ts, 128)
    TH = _pick_tile(H, th, 128)
    # NOTE: for tiny S/H (< 128, like the smoke test below) the tile degrades
    # to the full dim; stores are lane-sparse but the arrays are tiny anyway.

    grid = (B, pl.cdiv(S, TS), pl.cdiv(H, TH))

    return pl.pallas_call(
        _perm_kernel,
        out_shape=jax.ShapeDtypeStruct((B, H, S), x.dtype),
        grid_spec=pltpu.PrefetchScalarGridSpec(
            num_scalar_prefetch=0,
            grid=grid,
            in_specs=[
                pl.BlockSpec((pl.Squeezed(), TS, TH),
                             lambda b, s, h: (b, s, h)),
            ],
            out_specs=pl.BlockSpec((pl.Squeezed(), TH, TS),
                                   lambda b, s, h: (b, h, s)),
        ),
        compiler_params=pltpu.CompilerParams(
            # Pure data movement, no cross-iteration state: every axis is
            # parallel so megacore (v7x: 2 TCs) can split the grid.
            dimension_semantics=("parallel", "parallel", "parallel"),
        ),
        cost_estimate=pl.CostEstimate(
            flops=0,
            transcendentals=0,
            bytes_accessed=2 * B * S * H * itemsize,
        ),
    )(x)


if __name__ == "__main__":
    key = jax.random.PRNGKey(0)

    # Small shape consistent with the module's 3-D permute(0, 2, 1).
    B, S, H = 2, 8, 32
    x = jax.random.normal(key, (B, S, H), dtype=jnp.float32)
    out = jax.block_until_ready(perm_forward(x))
    ref = jnp.transpose(x, (0, 2, 1))
    assert out.shape == (B, H, S), out.shape
    assert jnp.array_equal(out, ref), "mismatch vs reference permute (small)"

    # Second check that exercises the tiled path with non-multiple-of-tile
    # edge blocks (masked edge loads/stores).
    B2, S2, H2 = 2, 200, 160
    x2 = jax.random.normal(jax.random.PRNGKey(1), (B2, S2, H2), dtype=jnp.float32)
    out2 = jax.block_until_ready(perm_forward(x2, ts=128, th=128))
    ref2 = jnp.transpose(x2, (0, 2, 1))
    assert out2.shape == (B2, H2, S2), out2.shape
    assert jnp.array_equal(out2, ref2), "mismatch vs reference permute (tiled)"

    print("KERNEL_OK")
</pallas_src>

<mosaic_0001>
module attributes {stable_mosaic.version = 11 : i64} {
  func.func @_perm_kernel(%arg0: i32, %arg1: i32, %arg2: i32, %arg3: memref<1x8x32xf32, #tpu.memory_space<vmem>>, %arg4: memref<1x32x8xf32, #tpu.memory_space<vmem>>) attributes {dimension_semantics = [#tpu.dimension_semantics<parallel>, #tpu.dimension_semantics<parallel>, #tpu.dimension_semantics<parallel>], iteration_bounds = array<i64: 2, 1, 1>, scalar_prefetch = 0 : i64, scratch_operands = 0 : i64, tpu.core_type = #tpu.core_type<tc>, window_params = [{transform_indices = @transform_0, window_bounds = array<i64: 1, 8, 32>}, {transform_indices = @transform_1, window_bounds = array<i64: 1, 32, 8>}]} {
    %c0 = arith.constant 0 : index
    %c0_0 = arith.constant 0 : index
    %c0_1 = arith.constant 0 : index
    %0 = vector.load %arg3[%c0, %c0_0, %c0_1] : memref<1x8x32xf32, #tpu.memory_space<vmem>>, vector<1x8x32xf32>
    %1 = vector.shape_cast %0 : vector<1x8x32xf32> to vector<8x32xf32>
    %2 = tpu.transpose %1, [1, 0] : vector<8x32xf32> -> vector<32x8xf32>
    %c0_2 = arith.constant 0 : index
    %c0_3 = arith.constant 0 : index
    %c0_4 = arith.constant 0 : index
    %3 = vector.load %arg4[%c0_2, %c0_3, %c0_4] : memref<1x32x8xf32, #tpu.memory_space<vmem>>, vector<1x32x8xf32>
    %4 = vector.shape_cast %3 : vector<1x32x8xf32> to vector<32x8xf32>
    %5 = vector.shape_cast %2 : vector<32x8xf32> to vector<1x32x8xf32>
    tpu.vector_store %arg4[%c0_2, %c0_3, %c0_4], %5 {strides = array<i32>} : memref<1x32x8xf32, #tpu.memory_space<vmem>>, vector<1x32x8xf32>,
    return
  }
  func.func @transform_0(%arg0: i32, %arg1: i32, %arg2: i32) -> (i32, i32, i32) {
    %c0_i32 = arith.constant 0 : i32
    return %arg0, %arg1, %arg2 : i32, i32, i32
  }
  func.func @transform_1(%arg0: i32, %arg1: i32, %arg2: i32) -> (i32, i32, i32) {
    %c0_i32 = arith.constant 0 : i32
    return %arg0, %arg2, %arg1 : i32, i32, i32
  }
}

</mosaic_0001>

<bundles_post_ra>
// kernel: tpu_custom_call.1
= control target key start
LH: loop header
LB: loop body
LE: loop exit
PB: predicated region body
PF: predicated region fallthrough
CT: control target
= control target key end

     0   :  { %6 = vsyncpa [#allocation3], 0  ;;  %s574_s0 = inlined_call_operand.hbm [shape: f32[2,8,32], index: 0, kind: input, shape index: {}]   ;;  %s575_s1 = inlined_call_operand.vmem [shape: f32[2,32,8], index: 1, kind: output, shape index: {}]  }
   0x1   :  { %8 = vsyncpa [#allocation3 + $0x1], 0  ;;  %s486_s6 = smov 0   ;;  %s488_s7 = smov 0  }
   0x2   :  { %s490_s8 = smov 0   ;;  %s492_s9 = smov 0  }
   0x3   :  { %s494_s10 = smov 0   ;;  %s496_s11 = smov 0  }
   0x4 LB: > { %s325_s12 = sadd.s32 4294967295, %s474_s11   ;;  %s33_s13 = sadd.s32 1, %s470_s10  ;;  %s474_s11 = sphi %s496_s11, %s14_s11   ;;  %s470_s10 = sphi %s494_s10, %s582_s10   ;;  %s466_s9 = sphi %s492_s9, %s581_s9   ;;  %s462_s8 = sphi %s490_s8, %s580_s8   ;;  %s458_s7 = sphi %s488_s7, %s579_s7   ;;  %s454_s6 = sphi %s486_s6, %s578_s6  }
   0x5   : > { %p35_p0 = scmp.ge.s32.totalorder %s33_s13, 2  ;;  %s44_s14 = sadd.s32 1, %s462_s8 }
   0x6   : > { %p51_p1 = scmp.ne.s32.totalorder %s462_s8, %s458_s7  ;;  %p52_p2 = scmp.eq.s32.totalorder %s474_s11, 0 }
   0x7   : > { %s584_s13 = smov (%p35_p0, %s33_s13), 0  ;;  %p57_p4 = scmp.ne.s32.totalorder %s458_s7, %s454_s6 }
   0x8   : > { %p522_p3 = por %p52_p2, %p51_p1  ;;  %s37_s16 = ssub.s32 %s470_s10, %s584_s13 }
   0x9   : > { %p58_p5 = scmp.eq.s32.totalorder %s325_s12, 0  ;;  %p42_p6 = scmp.eq.s32.totalorder %s37_s16, 0 }
   0xa   : > { %p344_p8 = scmp.lt.s32.totalorder %s474_s11, 2  ;;  %s111_s19 = sand.u32 1, %s462_s8  }
   0xb   : > { %p529_p7 = por %p58_p5, %p57_p4  ;;  %s330_s20 = sshll.u32 %s470_s10, 3 }
   0xc   : > { %s535_s18 = scalar_select %p42_p6, %s462_s8, %s44_s14  }
   0xd   : > { %s329_s21 = sshll.u32 %s111_s19, 3  ;;  %s121_s24 = scalar_lea.hbm %s574_s0, %s330_s20 }
   0xe   : > { %s123_s25 = sshll.u32 %s121_s24, 4  ;;  %s115_s26 = scalar_lea.vmem [#allocation2], %s329_s21  ;;  %s124_s25 = int_to_ptr.hbm [resolvable:$true] %s123_s25 }
   0xf   : > { %s125_s27 = sshll.u32 %s115_s26, 4  ;;  %p341_p9 = pnand %p344_p8, %p522_p3  ;;  %s126_s27 = int_to_ptr.vmem [resolvable:$true] %s125_s27 }
  0x10   : > { %p331_p10 = scmp.ge.s32.totalorder %s474_s11, 1  ;;  %p130_p11 = scmp.lt.s32.totalorder %s474_s11, 3 }
  0x11   : > { %s112_s28 = scalar_lea.sflag [#allocation3], %s111_s19 }
  0x12   : > { %343 = dma.hbm_to_vmem [thread:$0]  (!%p341_p9), %s124_s25, 128, %s126_s27, %s112_s28  }
  0x13   : > { %p131_p12 = pnand %p331_p10, %p130_p11 }
  0x14   : > { %s136_s29 = sand.u32 (!%p131_p12), 1, %s458_s7  }
  0x15   : > { %134 = sbr.rel (%p131_p12) target bundleno = 218 (0xda), region = 24  ;;  %s332_s30 = sshll.u32 (!%p131_p12), %s136_s29, 3 }
  0x16   : > { %s137_s2 = scalar_lea.sflag (!%p131_p12), [#allocation3], %s136_s29  ;;  %s140_s3 = scalar_lea.vmem (!%p131_p12), [#allocation2], %s332_s30 }
  0x1a   : > { %449 = dma.done.wait (%p529_p7), %s137_s2, 128  }
  0x1b   : > { %451 = vsyncadd (%p529_p7), %s137_s2, 4294967168  ;;  %v180_v0 = vld [vmem:[%s140_s3] sm:$0xff]  ;;  %p168_p13 = scmp.lt.s32.totalorder %s466_s9, 1  ;;  %vm213_vm0 = vcmask 64512  }
  0x1c   : > { %181 = vxpose.xlu0.b32.start.end [1/1] (short) (narrow) %v180_v0, 32 }
  0x1d   : > { %s586_s9 = smov (!%p168_p13, %s466_s9), 1 }
  0x1e   : > { %s337_s4 = sshll.u32 %s586_s9, 5 }
  0x1f   : > { %s178_s12 = scalar_lea.vmem %s575_s1, %s337_s4 }
  0xc0   : > { %v197_v1 = vpop.trf.xlu0 }
  0xc1   : > { %214 = vst.msk [vmem:[%s178_s12] sm:$0xff] %vm213_vm0, %v197_v1 }
  0xc8   : > { %v198_v2 = vpop.trf.xlu0 }
  0xc9   : > { %215 = vst.msk [vmem:[%s178_s12 + $0x8] sm:$0xff] %vm213_vm0, %v198_v2 }
  0xd0   : > { %v199_v3 = vpop.trf.xlu0 }
  0xd1   : > { %216 = vst.msk [vmem:[%s178_s12 + $0x10] sm:$0xff] %vm213_vm0, %v199_v3 }
  0xd8   : > { %v200_v4 = vpop.trf.xlu0 }
  0xd9   : > { %217 = vst.msk [vmem:[%s178_s12 + $0x18] sm:$0xff] %vm213_vm0, %v200_v4 }
  0xda PF: > { %s14_s11 = sadd.s32 1, %s474_s11   ;;  %s578_s6 = smov %s458_s7 }
  0xdb   : > { %p11_p0 = scmp.ge.s32.totalorder %s14_s11, 4   ;;  %s579_s7 = smov %s462_s8 }
  0xdc   : > { %s580_s8 = smov %s535_s18  ;;  %s581_s9 = smov %s470_s10 }
  0xdd   : > { %s582_s10 = smov %s584_s13  ;;  %13 = sbr.rel (!%p11_p0) target bundleno = 4 (0x4), region = 64 }
  0xe2   :  { %254 = vsyncpa [#allocation3], 1 }
  0xe3   :  { %256 = vsyncpa [#allocation3 + $0x1], 1 }

</bundles_post_ra>
